<compile_context>
chip_gen: v5e
topology: v5e:2x2
jax: 0.10.0
libtpu: 0.0.40
codegen_flags: <defaults>
</compile_context>

<pallas_src>
import functools

import jax
import jax.numpy as jnp
from jax import lax
from jax.experimental import pallas as pl
from jax.experimental.pallas import tpu as pltpu


def _round_up(x, m):
    return (x + m - 1) // m * m


def arima_predict_kernel(params_ref, x_ref, y_ref, *, p, d, steps, eps):
    """One lane tile of independent series.

    params_ref : SMEM (p+3,) f32  -> [ar_w[0..p-1], ar_b, revin_w, revin_b]
    x_ref      : VMEM (p, NT)     -> last p history rows of each series
    y_ref      : VMEM (PP, NT)    -> forecast rows (PP = pred_len rounded to 8)
    """
    # ---- loop-invariant scalars (SMEM scalar path, hoisted out of the loop) ----
    ar_w = [params_ref[i] for i in range(p)]
    ar_b = params_ref[p]
    w = params_ref[p + 1]
    b = params_ref[p + 2]
    inv_w = 1.0 / (w + eps * eps)          # RevIN denorm divisor (scalar divide)
    inv_p = 1.0 / float(p)

    # Zero padded tail rows (only when the output block is taller than `steps`).
    if y_ref.shape[0] != steps:
        y_ref[...] = jnp.zeros_like(y_ref)

    # Rolling p-row window, carried as p separate (1, NT) vreg rows.
    init = tuple(x_ref[i:i + 1, :] for i in range(p))

    def predict_one(win):
        # ---- RevIN 'norm': mean / population variance over the window ----
        mean = win[0]
        for r in win[1:]:
            mean = mean + r
        mean = mean * inv_p
        c0 = win[0] - mean
        var = c0 * c0
        for r in win[1:]:
            c = r - mean
            var = var + c * c
        s2 = var * inv_p + eps
        inv_std = lax.rsqrt(s2)            # EUP slot, no vector divide
        stdev = s2 * inv_std               # == sqrt(var + eps)
        scale = inv_std * w                # fold affine weight into the scale
        xn = [(r - mean) * scale + b for r in win]

        # ---- difference d times (first value kept) ----
        diff = list(xn)
        for _ in range(d):
            diff = [diff[0]] + [diff[i] - diff[i - 1] for i in range(1, p)]

        # ---- AR term: Linear(p, 1) over the flattened differenced window ----
        ar = diff[0] * ar_w[0]
        for i in range(1, p):
            ar = ar + diff[i] * ar_w[i]
        ar = ar + ar_b

        # ---- inverse difference (faithful to the reference implementation;
        #      only the last row of the final round is ever needed) ----
        pred_norm = ar
        forecast = [ar]
        for rnd in range(d):
            last = diff[-1]
            if rnd == d - 1:
                total = forecast[0]
                for fr in forecast[1:]:
                    total = total + fr
                pred_norm = last + total
            else:
                running = None
                new_rows = list(diff)
                for fr in forecast:
                    running = fr if running is None else running + fr
                    new_rows.append(last + running)
                forecast = new_rows

        # ---- RevIN 'denorm' ----
        return (pred_norm - b) * (stdev * inv_w) + mean        # (1, NT)

    if steps <= 16:
        # Full static unroll: static output-row indices -> unmasked stores.
        win = init
        for s in range(steps):
            pred = predict_one(win)
            y_ref[s:s + 1, :] = pred
            win = win[1:] + (pred,)
    else:
        def body(s, win):
            pred = predict_one(win)
            y_ref[pl.ds(s, 1), :] = pred
            return win[1:] + (pred,)

        lax.fori_loop(0, steps, body, init, unroll=4)


def arima_forecast(x_enc, ar_w, ar_b, ma_w, ma_b, *, p, d, pred_len,
                   eps=1e-5, n_tile=256):
    """Equivalent of Model.forward(x_enc, ...) for the 'forecast' task."""
    B, S, C = x_enc.shape
    assert S >= p, "history must be at least p steps long"
    N = B * C

    # (B, S, C) -> (S, N); only the last p rows are ever read by the recursion.
    x2d = jnp.transpose(x_enc, (1, 0, 2)).reshape(S, N).astype(jnp.float32)
    hist = x2d[S - p:, :]                                    # (p, N)

    n_tile = min(n_tile, _round_up(N, 128))                  # don't over-pad tiny N
    n_pad = _round_up(N, n_tile)                             # lane-dense, tileable
    pred_pad = _round_up(pred_len, 8)                        # sublane-aligned rows
    if n_pad != N:
        hist = jnp.pad(hist, ((0, 0), (0, n_pad - N)))       # zero lanes stay finite

    params = jnp.concatenate([
        jnp.asarray(ar_w, jnp.float32).reshape(p),
        jnp.asarray(ar_b, jnp.float32).reshape(1),
        jnp.asarray(ma_w, jnp.float32).reshape(1),
        jnp.asarray(ma_b, jnp.float32).reshape(1)])

    kernel = functools.partial(arima_predict_kernel, p=p, d=d,
                               steps=pred_len, eps=eps)

    out = pl.pallas_call(
        kernel,
        out_shape=jax.ShapeDtypeStruct((pred_pad, n_pad), jnp.float32),
        grid=(n_pad // n_tile,),
        in_specs=[
            pl.BlockSpec(memory_space=pltpu.MemorySpace.SMEM),   # model scalars
            pl.BlockSpec((p, n_tile), lambda i: (0, i)),         # history tile
        ],
        out_specs=pl.BlockSpec((pred_pad, n_tile), lambda i: (0, i)),
        compiler_params=pltpu.CompilerParams(
            dimension_semantics=("parallel",)),
    )(params, hist)

    fc = out[:pred_len, :N]                                  # strip padding
    return fc.reshape(pred_len, B, C).transpose(1, 0, 2)     # (B, pred_len, C)


def arima_forecast_ref(x_enc, ar_w, ar_b, ma_w, ma_b, *, p, d, pred_len, eps=1e-5):
    """Plain-JAX reference (mirrors the PyTorch semantics) for validation."""
    B, S, C = x_enc.shape
    N = B * C
    buf = jnp.concatenate(
        [jnp.transpose(x_enc, (1, 0, 2)).reshape(S, N).astype(jnp.float32),
         jnp.zeros((pred_len, N), jnp.float32)], axis=0)
    ar_w = jnp.asarray(ar_w, jnp.float32).reshape(p, 1)
    ar_b = jnp.float32(ar_b)
    w = jnp.float32(ma_w)
    b = jnp.float32(ma_b)
    for t in range(S, S + pred_len):
        inp = buf[t - p:t, :]
        mean = jnp.mean(inp, axis=0, keepdims=True)
        var = jnp.mean((inp - mean) ** 2, axis=0, keepdims=True)
        stdev = jnp.sqrt(var + eps)
        xn = (inp - mean) / stdev * w + b
        diff = xn
        for _ in range(d):
            diff = jnp.concatenate([diff[0:1], diff[1:] - diff[:-1]], axis=0)
        ar_term = jnp.sum(ar_w * diff, axis=0, keepdims=True) + ar_b
        forecast = ar_term
        for _ in range(d):
            last = diff[-1:, :]
            forecast = jnp.concatenate(
                [diff, last + jnp.cumsum(forecast, axis=0)], axis=0)
        pred_norm = forecast[-1:, :]
        pred = (pred_norm - b) / (w + eps * eps) * stdev + mean
        buf = buf.at[t].set(pred[0])
    fc = buf[S:, :]
    return fc.reshape(pred_len, B, C).transpose(1, 0, 2)


if __name__ == "__main__":
    # Small configuration consistent with the module: ARIMA(p, d, q), seq/pred lens.
    B, S, C = 2, 8, 3          # batch, seq_len, channels
    p, d, q = 4, 1, 1          # AR order, differencing order, (q unused in forward)
    pred_len = 4

    key = jax.random.PRNGKey(0)
    kx, kw = jax.random.split(key)
    x_enc = jax.random.normal(kx, (B, S, C), dtype=jnp.float32)
    # x_mark_enc / x_dec / x_mark_dec are unused by the forecast path.

    # Deterministic parameter init (shapes from ARIMA.__init__ / RevIN._init_params).
    ar_w = 0.1 * jax.random.normal(kw, (p,), dtype=jnp.float32)   # Linear(p, 1).weight
    ar_b = jnp.float32(0.05)                                      # Linear(p, 1).bias
    ma_w = jnp.float32(1.0)                                       # RevIN affine_weight
    ma_b = jnp.float32(0.0)                                       # RevIN affine_bias

    out = arima_forecast(x_enc, ar_w, ar_b, ma_w, ma_b,
                         p=p, d=d, pred_len=pred_len)
    out = jax.block_until_ready(out)

    ref = arima_forecast_ref(x_enc, ar_w, ar_b, ma_w, ma_b,
                             p=p, d=d, pred_len=pred_len)
    assert out.shape == (B, pred_len, C)
    assert jnp.allclose(out, ref, atol=1e-3, rtol=1e-3), (out, ref)

    print("KERNEL_OK")
</pallas_src>

<mosaic_0001>
module attributes {stable_mosaic.version = 11 : i64} {
  func.func @arima_predict_kernel(%arg0: i32, %arg1: memref<7xf32, #tpu.memory_space<smem>>, %arg2: memref<4x128xf32, #tpu.memory_space<vmem>>, %arg3: memref<8x128xf32, #tpu.memory_space<vmem>>) attributes {dimension_semantics = [#tpu.dimension_semantics<parallel>], iteration_bounds = array<i64: 1>, scalar_prefetch = 0 : i64, scratch_operands = 0 : i64, tpu.core_type = #tpu.core_type<tc>, window_params = [{transform_indices = @transform_0, window_bounds = array<i64: 7>}, {transform_indices = @transform_1, window_bounds = array<i64: 4, 128>}, {transform_indices = @transform_2, window_bounds = array<i64: 8, 128>}]} {
    %c0 = arith.constant 0 : index
    %0 = memref.load %arg1[%c0] : memref<7xf32, #tpu.memory_space<smem>>
    %c1 = arith.constant 1 : index
    %1 = memref.load %arg1[%c1] : memref<7xf32, #tpu.memory_space<smem>>
    %c2 = arith.constant 2 : index
    %2 = memref.load %arg1[%c2] : memref<7xf32, #tpu.memory_space<smem>>
    %c3 = arith.constant 3 : index
    %3 = memref.load %arg1[%c3] : memref<7xf32, #tpu.memory_space<smem>>
    %c4 = arith.constant 4 : index
    %4 = memref.load %arg1[%c4] : memref<7xf32, #tpu.memory_space<smem>>
    %c5 = arith.constant 5 : index
    %5 = memref.load %arg1[%c5] : memref<7xf32, #tpu.memory_space<smem>>
    %c6 = arith.constant 6 : index
    %6 = memref.load %arg1[%c6] : memref<7xf32, #tpu.memory_space<smem>>
    %cst = arith.constant 1.000000e-10 : f32
    %7 = arith.addf %5, %cst : f32
    %cst_0 = arith.constant 1.000000e+00 : f32
    %8 = arith.divf %cst_0, %7 : f32
    %cst_1 = arith.constant 0.000000e+00 : f32
    %9 = vector.broadcast %cst_1 : f32 to vector<8x128xf32>
    %c0_2 = arith.constant 0 : index
    %c0_3 = arith.constant 0 : index
    %10 = vector.load %arg3[%c0_2, %c0_3] : memref<8x128xf32, #tpu.memory_space<vmem>>, vector<8x128xf32>
    tpu.vector_store %arg3[%c0_2, %c0_3], %9 {strides = array<i32>} : memref<8x128xf32, #tpu.memory_space<vmem>>, vector<8x128xf32>,
    %c0_4 = arith.constant 0 : index
    %c0_5 = arith.constant 0 : index
    %11 = vector.load %arg2[%c0_4, %c0_5] : memref<4x128xf32, #tpu.memory_space<vmem>>, vector<1x128xf32>
    %c1_6 = arith.constant 1 : index
    %c0_7 = arith.constant 0 : index
    %12 = vector.load %arg2[%c1_6, %c0_7] : memref<4x128xf32, #tpu.memory_space<vmem>>, vector<1x128xf32>
    %c2_8 = arith.constant 2 : index
    %c0_9 = arith.constant 0 : index
    %13 = vector.load %arg2[%c2_8, %c0_9] : memref<4x128xf32, #tpu.memory_space<vmem>>, vector<1x128xf32>
    %c3_10 = arith.constant 3 : index
    %c0_11 = arith.constant 0 : index
    %14 = vector.load %arg2[%c3_10, %c0_11] : memref<4x128xf32, #tpu.memory_space<vmem>>, vector<1x128xf32>
    %15 = arith.addf %11, %12 : vector<1x128xf32>
    %16 = arith.addf %15, %13 : vector<1x128xf32>
    %17 = arith.addf %16, %14 : vector<1x128xf32>
    %cst_12 = arith.constant 2.500000e-01 : f32
    %18 = vector.broadcast %cst_12 : f32 to vector<1x128xf32>
    %19 = arith.mulf %17, %18 : vector<1x128xf32>
    %20 = arith.subf %11, %19 : vector<1x128xf32>
    %21 = arith.mulf %20, %20 : vector<1x128xf32>
    %22 = arith.subf %12, %19 : vector<1x128xf32>
    %23 = arith.mulf %22, %22 : vector<1x128xf32>
    %24 = arith.addf %21, %23 : vector<1x128xf32>
    %25 = arith.subf %13, %19 : vector<1x128xf32>
    %26 = arith.mulf %25, %25 : vector<1x128xf32>
    %27 = arith.addf %24, %26 : vector<1x128xf32>
    %28 = arith.subf %14, %19 : vector<1x128xf32>
    %29 = arith.mulf %28, %28 : vector<1x128xf32>
    %30 = arith.addf %27, %29 : vector<1x128xf32>
    %cst_13 = arith.constant 2.500000e-01 : f32
    %31 = vector.broadcast %cst_13 : f32 to vector<1x128xf32>
    %32 = arith.mulf %30, %31 : vector<1x128xf32>
    %cst_14 = arith.constant 9.99999974E-6 : f32
    %33 = vector.broadcast %cst_14 : f32 to vector<1x128xf32>
    %34 = arith.addf %32, %33 : vector<1x128xf32>
    %35 = math.rsqrt %34 : vector<1x128xf32>
    %36 = arith.mulf %34, %35 : vector<1x128xf32>
    %37 = vector.broadcast %5 : f32 to vector<1x128xf32>
    %38 = arith.mulf %35, %37 : vector<1x128xf32>
    %39 = arith.subf %11, %19 : vector<1x128xf32>
    %40 = arith.mulf %39, %38 : vector<1x128xf32>
    %41 = vector.broadcast %6 : f32 to vector<1x128xf32>
    %42 = arith.addf %40, %41 : vector<1x128xf32>
    %43 = arith.subf %12, %19 : vector<1x128xf32>
    %44 = arith.mulf %43, %38 : vector<1x128xf32>
    %45 = vector.broadcast %6 : f32 to vector<1x128xf32>
    %46 = arith.addf %44, %45 : vector<1x128xf32>
    %47 = arith.subf %13, %19 : vector<1x128xf32>
    %48 = arith.mulf %47, %38 : vector<1x128xf32>
    %49 = vector.broadcast %6 : f32 to vector<1x128xf32>
    %50 = arith.addf %48, %49 : vector<1x128xf32>
    %51 = arith.subf %14, %19 : vector<1x128xf32>
    %52 = arith.mulf %51, %38 : vector<1x128xf32>
    %53 = vector.broadcast %6 : f32 to vector<1x128xf32>
    %54 = arith.addf %52, %53 : vector<1x128xf32>
    %55 = arith.subf %46, %42 : vector<1x128xf32>
    %56 = arith.subf %50, %46 : vector<1x128xf32>
    %57 = arith.subf %54, %50 : vector<1x128xf32>
    %58 = vector.broadcast %0 : f32 to vector<1x128xf32>
    %59 = arith.mulf %42, %58 : vector<1x128xf32>
    %60 = vector.broadcast %1 : f32 to vector<1x128xf32>
    %61 = arith.mulf %55, %60 : vector<1x128xf32>
    %62 = arith.addf %59, %61 : vector<1x128xf32>
    %63 = vector.broadcast %2 : f32 to vector<1x128xf32>
    %64 = arith.mulf %56, %63 : vector<1x128xf32>
    %65 = arith.addf %62, %64 : vector<1x128xf32>
    %66 = vector.broadcast %3 : f32 to vector<1x128xf32>
    %67 = arith.mulf %57, %66 : vector<1x128xf32>
    %68 = arith.addf %65, %67 : vector<1x128xf32>
    %69 = vector.broadcast %4 : f32 to vector<1x128xf32>
    %70 = arith.addf %68, %69 : vector<1x128xf32>
    %71 = arith.addf %57, %70 : vector<1x128xf32>
    %72 = vector.broadcast %6 : f32 to vector<1x128xf32>
    %73 = arith.subf %71, %72 : vector<1x128xf32>
    %74 = vector.broadcast %8 : f32 to vector<1x128xf32>
    %75 = arith.mulf %36, %74 : vector<1x128xf32>
    %76 = arith.mulf %73, %75 : vector<1x128xf32>
    %77 = arith.addf %76, %19 : vector<1x128xf32>
    %c0_15 = arith.constant 0 : index
    %c0_16 = arith.constant 0 : index
    %78 = vector.load %arg3[%c0_15, %c0_16] : memref<8x128xf32, #tpu.memory_space<vmem>>, vector<1x128xf32>
    tpu.vector_store %arg3[%c0_15, %c0_16], %77 {strides = array<i32>} : memref<8x128xf32, #tpu.memory_space<vmem>>, vector<1x128xf32>,
    %79 = arith.addf %12, %13 : vector<1x128xf32>
    %80 = arith.addf %79, %14 : vector<1x128xf32>
    %81 = arith.addf %80, %77 : vector<1x128xf32>
    %cst_17 = arith.constant 2.500000e-01 : f32
    %82 = vector.broadcast %cst_17 : f32 to vector<1x128xf32>
    %83 = arith.mulf %81, %82 : vector<1x128xf32>
    %84 = arith.subf %12, %83 : vector<1x128xf32>
    %85 = arith.mulf %84, %84 : vector<1x128xf32>
    %86 = arith.subf %13, %83 : vector<1x128xf32>
    %87 = arith.mulf %86, %86 : vector<1x128xf32>
    %88 = arith.addf %85, %87 : vector<1x128xf32>
    %89 = arith.subf %14, %83 : vector<1x128xf32>
    %90 = arith.mulf %89, %89 : vector<1x128xf32>
    %91 = arith.addf %88, %90 : vector<1x128xf32>
    %92 = arith.subf %77, %83 : vector<1x128xf32>
    %93 = arith.mulf %92, %92 : vector<1x128xf32>
    %94 = arith.addf %91, %93 : vector<1x128xf32>
    %cst_18 = arith.constant 2.500000e-01 : f32
    %95 = vector.broadcast %cst_18 : f32 to vector<1x128xf32>
    %96 = arith.mulf %94, %95 : vector<1x128xf32>
    %cst_19 = arith.constant 9.99999974E-6 : f32
    %97 = vector.broadcast %cst_19 : f32 to vector<1x128xf32>
    %98 = arith.addf %96, %97 : vector<1x128xf32>
    %99 = math.rsqrt %98 : vector<1x128xf32>
    %100 = arith.mulf %98, %99 : vector<1x128xf32>
    %101 = vector.broadcast %5 : f32 to vector<1x128xf32>
    %102 = arith.mulf %99, %101 : vector<1x128xf32>
    %103 = arith.subf %12, %83 : vector<1x128xf32>
    %104 = arith.mulf %103, %102 : vector<1x128xf32>
    %105 = vector.broadcast %6 : f32 to vector<1x128xf32>
    %106 = arith.addf %104, %105 : vector<1x128xf32>
    %107 = arith.subf %13, %83 : vector<1x128xf32>
    %108 = arith.mulf %107, %102 : vector<1x128xf32>
    %109 = vector.broadcast %6 : f32 to vector<1x128xf32>
    %110 = arith.addf %108, %109 : vector<1x128xf32>
    %111 = arith.subf %14, %83 : vector<1x128xf32>
    %112 = arith.mulf %111, %102 : vector<1x128xf32>
    %113 = vector.broadcast %6 : f32 to vector<1x128xf32>
    %114 = arith.addf %112, %113 : vector<1x128xf32>
    %115 = arith.subf %77, %83 : vector<1x128xf32>
    %116 = arith.mulf %115, %102 : vector<1x128xf32>
    %117 = vector.broadcast %6 : f32 to vector<1x128xf32>
    %118 = arith.addf %116, %117 : vector<1x128xf32>
    %119 = arith.subf %110, %106 : vector<1x128xf32>
    %120 = arith.subf %114, %110 : vector<1x128xf32>
    %121 = arith.subf %118, %114 : vector<1x128xf32>
    %122 = vector.broadcast %0 : f32 to vector<1x128xf32>
    %123 = arith.mulf %106, %122 : vector<1x128xf32>
    %124 = vector.broadcast %1 : f32 to vector<1x128xf32>
    %125 = arith.mulf %119, %124 : vector<1x128xf32>
    %126 = arith.addf %123, %125 : vector<1x128xf32>
    %127 = vector.broadcast %2 : f32 to vector<1x128xf32>
    %128 = arith.mulf %120, %127 : vector<1x128xf32>
    %129 = arith.addf %126, %128 : vector<1x128xf32>
    %130 = vector.broadcast %3 : f32 to vector<1x128xf32>
    %131 = arith.mulf %121, %130 : vector<1x128xf32>
    %132 = arith.addf %129, %131 : vector<1x128xf32>
    %133 = vector.broadcast %4 : f32 to vector<1x128xf32>
    %134 = arith.addf %132, %133 : vector<1x128xf32>
    %135 = arith.addf %121, %134 : vector<1x128xf32>
    %136 = vector.broadcast %6 : f32 to vector<1x128xf32>
    %137 = arith.subf %135, %136 : vector<1x128xf32>
    %138 = vector.broadcast %8 : f32 to vector<1x128xf32>
    %139 = arith.mulf %100, %138 : vector<1x128xf32>
    %140 = arith.mulf %137, %139 : vector<1x128xf32>
    %141 = arith.addf %140, %83 : vector<1x128xf32>
    %c1_20 = arith.constant 1 : index
    %c0_21 = arith.constant 0 : index
    %142 = vector.load %arg3[%c1_20, %c0_21] : memref<8x128xf32, #tpu.memory_space<vmem>>, vector<1x128xf32>
    tpu.vector_store %arg3[%c1_20, %c0_21], %141 {strides = array<i32>} : memref<8x128xf32, #tpu.memory_space<vmem>>, vector<1x128xf32>,
    %143 = arith.addf %13, %14 : vector<1x128xf32>
    %144 = arith.addf %143, %77 : vector<1x128xf32>
    %145 = arith.addf %144, %141 : vector<1x128xf32>
    %cst_22 = arith.constant 2.500000e-01 : f32
    %146 = vector.broadcast %cst_22 : f32 to vector<1x128xf32>
    %147 = arith.mulf %145, %146 : vector<1x128xf32>
    %148 = arith.subf %13, %147 : vector<1x128xf32>
    %149 = arith.mulf %148, %148 : vector<1x128xf32>
    %150 = arith.subf %14, %147 : vector<1x128xf32>
    %151 = arith.mulf %150, %150 : vector<1x128xf32>
    %152 = arith.addf %149, %151 : vector<1x128xf32>
    %153 = arith.subf %77, %147 : vector<1x128xf32>
    %154 = arith.mulf %153, %153 : vector<1x128xf32>
    %155 = arith.addf %152, %154 : vector<1x128xf32>
    %156 = arith.subf %141, %147 : vector<1x128xf32>
    %157 = arith.mulf %156, %156 : vector<1x128xf32>
    %158 = arith.addf %155, %157 : vector<1x128xf32>
    %cst_23 = arith.constant 2.500000e-01 : f32
    %159 = vector.broadcast %cst_23 : f32 to vector<1x128xf32>
    %160 = arith.mulf %158, %159 : vector<1x128xf32>
    %cst_24 = arith.constant 9.99999974E-6 : f32
    %161 = vector.broadcast %cst_24 : f32 to vector<1x128xf32>
    %162 = arith.addf %160, %161 : vector<1x128xf32>
    %163 = math.rsqrt %162 : vector<1x128xf32>
    %164 = arith.mulf %162, %163 : vector<1x128xf32>
    %165 = vector.broadcast %5 : f32 to vector<1x128xf32>
    %166 = arith.mulf %163, %165 : vector<1x128xf32>
    %167 = arith.subf %13, %147 : vector<1x128xf32>
    %168 = arith.mulf %167, %166 : vector<1x128xf32>
    %169 = vector.broadcast %6 : f32 to vector<1x128xf32>
    %170 = arith.addf %168, %169 : vector<1x128xf32>
    %171 = arith.subf %14, %147 : vector<1x128xf32>
    %172 = arith.mulf %171, %166 : vector<1x128xf32>
    %173 = vector.broadcast %6 : f32 to vector<1x128xf32>
    %174 = arith.addf %172, %173 : vector<1x128xf32>
    %175 = arith.subf %77, %147 : vector<1x128xf32>
    %176 = arith.mulf %175, %166 : vector<1x128xf32>
    %177 = vector.broadcast %6 : f32 to vector<1x128xf32>
    %178 = arith.addf %176, %177 : vector<1x128xf32>
    %179 = arith.subf %141, %147 : vector<1x128xf32>
    %180 = arith.mulf %179, %166 : vector<1x128xf32>
    %181 = vector.broadcast %6 : f32 to vector<1x128xf32>
    %182 = arith.addf %180, %181 : vector<1x128xf32>
    %183 = arith.subf %174, %170 : vector<1x128xf32>
    %184 = arith.subf %178, %174 : vector<1x128xf32>
    %185 = arith.subf %182, %178 : vector<1x128xf32>
    %186 = vector.broadcast %0 : f32 to vector<1x128xf32>
    %187 = arith.mulf %170, %186 : vector<1x128xf32>
    %188 = vector.broadcast %1 : f32 to vector<1x128xf32>
    %189 = arith.mulf %183, %188 : vector<1x128xf32>
    %190 = arith.addf %187, %189 : vector<1x128xf32>
    %191 = vector.broadcast %2 : f32 to vector<1x128xf32>
    %192 = arith.mulf %184, %191 : vector<1x128xf32>
    %193 = arith.addf %190, %192 : vector<1x128xf32>
    %194 = vector.broadcast %3 : f32 to vector<1x128xf32>
    %195 = arith.mulf %185, %194 : vector<1x128xf32>
    %196 = arith.addf %193, %195 : vector<1x128xf32>
    %197 = vector.broadcast %4 : f32 to vector<1x128xf32>
    %198 = arith.addf %196, %197 : vector<1x128xf32>
    %199 = arith.addf %185, %198 : vector<1x128xf32>
    %200 = vector.broadcast %6 : f32 to vector<1x128xf32>
    %201 = arith.subf %199, %200 : vector<1x128xf32>
    %202 = vector.broadcast %8 : f32 to vector<1x128xf32>
    %203 = arith.mulf %164, %202 : vector<1x128xf32>
    %204 = arith.mulf %201, %203 : vector<1x128xf32>
    %205 = arith.addf %204, %147 : vector<1x128xf32>
    %c2_25 = arith.constant 2 : index
    %c0_26 = arith.constant 0 : index
    %206 = vector.load %arg3[%c2_25, %c0_26] : memref<8x128xf32, #tpu.memory_space<vmem>>, vector<1x128xf32>
    tpu.vector_store %arg3[%c2_25, %c0_26], %205 {strides = array<i32>} : memref<8x128xf32, #tpu.memory_space<vmem>>, vector<1x128xf32>,
    %207 = arith.addf %14, %77 : vector<1x128xf32>
    %208 = arith.addf %207, %141 : vector<1x128xf32>
    %209 = arith.addf %208, %205 : vector<1x128xf32>
    %cst_27 = arith.constant 2.500000e-01 : f32
    %210 = vector.broadcast %cst_27 : f32 to vector<1x128xf32>
    %211 = arith.mulf %209, %210 : vector<1x128xf32>
    %212 = arith.subf %14, %211 : vector<1x128xf32>
    %213 = arith.mulf %212, %212 : vector<1x128xf32>
    %214 = arith.subf %77, %211 : vector<1x128xf32>
    %215 = arith.mulf %214, %214 : vector<1x128xf32>
    %216 = arith.addf %213, %215 : vector<1x128xf32>
    %217 = arith.subf %141, %211 : vector<1x128xf32>
    %218 = arith.mulf %217, %217 : vector<1x128xf32>
    %219 = arith.addf %216, %218 : vector<1x128xf32>
    %220 = arith.subf %205, %211 : vector<1x128xf32>
    %221 = arith.mulf %220, %220 : vector<1x128xf32>
    %222 = arith.addf %219, %221 : vector<1x128xf32>
    %cst_28 = arith.constant 2.500000e-01 : f32
    %223 = vector.broadcast %cst_28 : f32 to vector<1x128xf32>
    %224 = arith.mulf %222, %223 : vector<1x128xf32>
    %cst_29 = arith.constant 9.99999974E-6 : f32
    %225 = vector.broadcast %cst_29 : f32 to vector<1x128xf32>
    %226 = arith.addf %224, %225 : vector<1x128xf32>
    %227 = math.rsqrt %226 : vector<1x128xf32>
    %228 = arith.mulf %226, %227 : vector<1x128xf32>
    %229 = vector.broadcast %5 : f32 to vector<1x128xf32>
    %230 = arith.mulf %227, %229 : vector<1x128xf32>
    %231 = arith.subf %14, %211 : vector<1x128xf32>
    %232 = arith.mulf %231, %230 : vector<1x128xf32>
    %233 = vector.broadcast %6 : f32 to vector<1x128xf32>
    %234 = arith.addf %232, %233 : vector<1x128xf32>
    %235 = arith.subf %77, %211 : vector<1x128xf32>
    %236 = arith.mulf %235, %230 : vector<1x128xf32>
    %237 = vector.broadcast %6 : f32 to vector<1x128xf32>
    %238 = arith.addf %236, %237 : vector<1x128xf32>
    %239 = arith.subf %141, %211 : vector<1x128xf32>
    %240 = arith.mulf %239, %230 : vector<1x128xf32>
    %241 = vector.broadcast %6 : f32 to vector<1x128xf32>
    %242 = arith.addf %240, %241 : vector<1x128xf32>
    %243 = arith.subf %205, %211 : vector<1x128xf32>
    %244 = arith.mulf %243, %230 : vector<1x128xf32>
    %245 = vector.broadcast %6 : f32 to vector<1x128xf32>
    %246 = arith.addf %244, %245 : vector<1x128xf32>
    %247 = arith.subf %238, %234 : vector<1x128xf32>
    %248 = arith.subf %242, %238 : vector<1x128xf32>
    %249 = arith.subf %246, %242 : vector<1x128xf32>
    %250 = vector.broadcast %0 : f32 to vector<1x128xf32>
    %251 = arith.mulf %234, %250 : vector<1x128xf32>
    %252 = vector.broadcast %1 : f32 to vector<1x128xf32>
    %253 = arith.mulf %247, %252 : vector<1x128xf32>
    %254 = arith.addf %251, %253 : vector<1x128xf32>
    %255 = vector.broadcast %2 : f32 to vector<1x128xf32>
    %256 = arith.mulf %248, %255 : vector<1x128xf32>
    %257 = arith.addf %254, %256 : vector<1x128xf32>
    %258 = vector.broadcast %3 : f32 to vector<1x128xf32>
    %259 = arith.mulf %249, %258 : vector<1x128xf32>
    %260 = arith.addf %257, %259 : vector<1x128xf32>
    %261 = vector.broadcast %4 : f32 to vector<1x128xf32>
    %262 = arith.addf %260, %261 : vector<1x128xf32>
    %263 = arith.addf %249, %262 : vector<1x128xf32>
    %264 = vector.broadcast %6 : f32 to vector<1x128xf32>
    %265 = arith.subf %263, %264 : vector<1x128xf32>
    %266 = vector.broadcast %8 : f32 to vector<1x128xf32>
    %267 = arith.mulf %228, %266 : vector<1x128xf32>
    %268 = arith.mulf %265, %267 : vector<1x128xf32>
    %269 = arith.addf %268, %211 : vector<1x128xf32>
    %c3_30 = arith.constant 3 : index
    %c0_31 = arith.constant 0 : index
    %270 = vector.load %arg3[%c3_30, %c0_31] : memref<8x128xf32, #tpu.memory_space<vmem>>, vector<1x128xf32>
    tpu.vector_store %arg3[%c3_30, %c0_31], %269 {strides = array<i32>} : memref<8x128xf32, #tpu.memory_space<vmem>>, vector<1x128xf32>,
    return
  }
  func.func @transform_0(%arg0: i32) -> i32 {
    %c0_i32 = arith.constant 0 : i32
    %c0_i32_0 = arith.constant 0 : i32
    return %c0_i32 : i32
  }
  func.func @transform_1(%arg0: i32) -> (i32, i32) {
    %c0_i32 = arith.constant 0 : i32
    %c0_i32_0 = arith.constant 0 : i32
    return %c0_i32, %arg0 : i32, i32
  }
  func.func @transform_2(%arg0: i32) -> (i32, i32) {
    %c0_i32 = arith.constant 0 : i32
    %c0_i32_0 = arith.constant 0 : i32
    return %c0_i32, %arg0 : i32, i32
  }
}

</mosaic_0001>

<bundles_post_ra>
// kernel: tpu_custom_call.1
= control target key start
LH: loop header
LB: loop body
LE: loop exit
PB: predicated region body
PF: predicated region fallthrough
CT: control target
= control target key end

     0   :  { %7 = vsyncpa [#allocation5], 0  ;;  %s534_s0 = inlined_call_operand.hbm [shape: f32[7], index: 0, kind: input, shape index: {}]   ;;  %s535_s1 = inlined_call_operand.hbm [shape: f32[4,128], index: 1, kind: input, shape index: {}]   ;;  %s536_s2 = inlined_call_operand.hbm [shape: f32[8,128], index: 2, kind: output, shape index: {}]  }
   0x1   :  { %8 = vsyncpa [#allocation3], 0 }
   0x2   :  { %9 = vsyncpa [#allocation4], 0  ;;  %s15_s11 = sshll.u32 %s534_s0, 4  ;;  %s24_s14 = sshll.u32 %s535_s1, 4  ;;  %s16_s11 = int_to_ptr.hbm [resolvable:$true] %s15_s11  ;;  %s25_s14 = int_to_ptr.hbm [resolvable:$true] %s24_s14 }
   0x3   :  { %s398_s15 = smov [#allocation2]   ;;  %s399_s16 = smov [#allocation6]  }
   0x4   :  { %18 = dma.hbm_to_smem %s16_s11, 16, %s398_s15, [#allocation5]  }
   0x5   :  { %s26_s17 = sshll.u32 %s399_s16, 4  ;;  %s27_s17 = int_to_ptr.vmem [resolvable:$true] %s26_s17 }
   0x6   :  { %29 = dma.hbm_to_vmem [thread:$0]  %s25_s14, 64, %s27_s17, [#allocation3]  }
   0x7   :  { %392 = dma.done.wait [#allocation5], 16  }
   0x8   :  { %393 = vsyncadd [#allocation5], 4294967280 }
   0x9   :  { %394 = dma.done.wait [#allocation3], 64  }
   0xa   :  { %395 = vsyncadd [#allocation3], 4294967232 }
   0xb   :  { %38 = sfence }
   0xc   :  { %v64_v0 = vld [vmem:[#allocation6] sm:$0x1]  ;;  %v423_v1 = vld [vmem:[#allocation6 + $0x1] sm:$0x1]  ;;  %v425_v2 = vld [vmem:[#allocation6 + $0x2] sm:$0x1] }
   0xd   :  { %v68_v3 = vadd.f32 %v423_v1, %v64_v0  ;;  %v428_v4 = vld [vmem:[#allocation6 + $0x3] sm:$0x1]  ;;  %s431_s0 = sld [smem:[#allocation2 + $0x5]]  ;;  %v400_v47 = vmov 0.0   ;;  %s401_s25 = smov [#allocation7]  }
   0xe   :  { %s315_s18 = sld [smem:[#allocation2 + $0x6]]  ;;  %63 = vst [vmem:[#allocation7] sm:$0xff] %v400_v47  ;;  %s297_s26 = sshll.u32 %s401_s25, 4  ;;  %s298_s26 = int_to_ptr.vmem [resolvable:$true] %s297_s26 }
   0xf   :  { %v69_v5 = vadd.f32 %v68_v3, %v425_v2  ;;  %s39_s19 = sld [smem:[#allocation2]]  ;;  %s299_s29 = sshll.u32 %s536_s2, 4  ;;  %s300_s29 = int_to_ptr.hbm [resolvable:$true] %s299_s29 }
  0x10   :  { %s310_s20 = sld [smem:[#allocation2 + $0x1]] }
  0x11   :  { %v70_v6 = vadd.f32 %v69_v5, %v428_v4  ;;  %s311_s21 = sld [smem:[#allocation2 + $0x2]] }
  0x12   :  { %s312_s22 = sld [smem:[#allocation2 + $0x3]] }
  0x13   :  { %v434_v7 = vmul.f32 0.25, %v70_v6  ;;  %s46_s1 = sadd.f32 1e-10, %s431_s0  ;;  %v445_v38 = vstv %s431_s0 }
  0x14   :  { %v448_v43 = vstv %s315_s18  ;;  %s313_s23 = sld [smem:[#allocation2 + $0x4]] }
  0x15   :  { %v72_v8 = vsub.f32 %v64_v0, %v434_v7  ;;  %v74_v9 = vsub.f32 %v423_v1, %v434_v7  ;;  %v77_v10 = vsub.f32 %v425_v2, %v434_v7  ;;  %v80_v11 = vsub.f32 %v428_v4, %v434_v7 }
  0x16   :  { %v47_v15 = vstv %s46_s1  ;;  %v453_v51 = vstv %s39_s19  ;;  %v455_v52 = vstv %s310_s20 }
  0x17   :  { %v73_v12 = vmul.f32 %v72_v8, %v72_v8  ;;  %v75_v13 = vmul.f32 %v74_v9, %v74_v9  ;;  %v78_v14 = vmul.f32 %v77_v10, %v77_v10  ;;  %v81_v17 = vmul.f32 %v80_v11, %v80_v11 }
  0x18   :  { %322 = vrcp.f32 %v47_v15  ;;  %vm53_vm0 = vweird.f32 %v47_v15  ;;  %v59_v24 = vand.u32 2147483648, %v47_v15  ;;  %v57_v26 = vand.u32 2147483647, %v47_v15 }
  0x19   :  { %v76_v16 = vadd.f32 %v75_v13, %v73_v12  ;;  %v460_v57 = vstv %s311_s21  ;;  %v463_v61 = vstv %s312_s22 }
  0x1a   :  { %v60_v28 = vor.u32 1.1754944e-38, %v59_v24  ;;  %vm58_vm3 = vcmp.eq.f32.partialorder %v57_v26, 8.507059e+37  ;;  %v466_v3 = vstv %s313_s23 }
  0x1b   :  { %v79_v18 = vadd.f32 %v78_v14, %v76_v16 }
  0x1d   :  { %v82_v19 = vadd.f32 %v81_v17, %v79_v18 }
  0x1e   :  { %v323_v21 = vpop.eup %322 }
  0x1f   :  { %v83_v20 = vmul.f32 0.25, %v82_v19  ;;  %v49_v22 = vmul.f32 %v323_v21, %v47_v15  ;;  %vm54_vm1 = vweird.f32 %v323_v21 }
  0x20   :  { %vm55_vm2 = vmor %vm53_vm0, %vm54_vm1 }
  0x21   :  { %v84_v23 = vadd.f32 1e-05, %v83_v20  ;;  %v50_v25 = vsub.f32 1.0, %v49_v22 }
  0x23   :  { %324 = vrsqrt.f32 %v84_v23  ;;  %v51_v27 = vmul.f32 %v323_v21, %v50_v25  ;;  %vm91_vm4 = vweird.f32 %v84_v23 }
  0x25   :  { %v52_v29 = vadd.f32 %v323_v21, %v51_v27 }
  0x27   :  { %v56_v31 = vsel %vm55_vm2, %v323_v21, %v52_v29 }
  0x28   :  { %v61_v32 = vsel %vm58_vm3, %v60_v28, %v56_v31 }
  0x29   :  { %v325_v30 = vpop.eup %324  ;;  %316 = vpush %v61_v32 }
  0x2a   :  { %v86_v33 = vmul.f32 %v325_v30, %v84_v23  ;;  %vm92_vm5 = vweird.f32 %v325_v30 }
  0x2b   :  { %vm93_vm6 = vmor %vm91_vm4, %vm92_vm5 }
  0x2c   :  { %v87_v34 = vmul.f32 %v325_v30, %v86_v33 }
  0x2e   :  { %v88_v35 = vmul.f32 0.5, %v87_v34 }
  0x30   :  { %v89_v36 = vsub.f32 1.5, %v88_v35 }
  0x32   :  { %v90_v37 = vmul.f32 %v325_v30, %v89_v36 }
  0x34   :  { %v94_v39 = vsel %vm93_vm6, %v325_v30, %v90_v37 }
  0x35   :  { %v97_v40 = vmul.f32 %v445_v38, %v94_v39 }
  0x37   :  { %v98_v41 = vmul.f32 %v97_v40, %v72_v8  ;;  %v101_v42 = vmul.f32 %v97_v40, %v74_v9  ;;  %v103_v46 = vmul.f32 %v97_v40, %v77_v10  ;;  %v105_v49 = vmul.f32 %v97_v40, %v80_v11 }
  0x38   :  { %v95_v8 = vmul.f32 %v94_v39, %v84_v23  ;;  %v130_v10 = vadd.f32 %v425_v2, %v423_v1 }
  0x39   :  { %v100_v44 = vadd.f32 %v448_v43, %v98_v41  ;;  %v102_v45 = vadd.f32 %v101_v42, %v448_v43  ;;  %v104_v48 = vadd.f32 %v103_v46, %v448_v43  ;;  %v106_v53 = vadd.f32 %v105_v49, %v448_v43 }
  0x3a   :  { %v131_v14 = vadd.f32 %v130_v10, %v428_v4 }
  0x3b   :  { %v107_v50 = vsub.f32 %v102_v45, %v100_v44  ;;  %v108_v54 = vsub.f32 %v104_v48, %v102_v45  ;;  %v111_v55 = vmul.f32 %v453_v51, %v100_v44  ;;  %v109_v58 = vsub.f32 %v106_v53, %v104_v48 }
  0x3d   :  { %v113_v56 = vmul.f32 %v455_v52, %v107_v50  ;;  %v116_v60 = vmul.f32 %v460_v57, %v108_v54  ;;  %v119_v63 = vmul.f32 %v463_v61, %v109_v58 }
  0x3f   :  { %v114_v59 = vadd.f32 %v113_v56, %v111_v55 }
  0x41   :  { %v117_v62 = vadd.f32 %v116_v60, %v114_v59 }
  0x43   :  { %v120_v0 = vadd.f32 %v119_v63, %v117_v62 }
  0x45   :  { %v122_v5 = vadd.f32 %v466_v3, %v120_v0 }
  0x47   :  { %v123_v6 = vadd.f32 %v122_v5, %v109_v58 }
  0x49   :  { %v124_v9 = vsub.f32 %v123_v6, %v448_v43  ;;  %v184_v6 = vadd.f32 %v428_v4, %v425_v2 }
  0x5a   :  { %s317_s24 = spop %316 }
  0x5b   :  { %v472_v11 = vstv %s317_s24 }
  0x5c   :  { %v126_v12 = vmul.f32 %v472_v11, %v95_v8 }
  0x5e   :  { %v127_v13 = vmul.f32 %v126_v12, %v124_v9 }
  0x60   :  { %v477_v15 = vadd.f32 %v127_v13, %v434_v7 }
  0x62   :  { %129 = vst [vmem:[#allocation7] sm:$0x1] %v477_v15  ;;  %v132_v16 = vadd.f32 %v131_v14, %v477_v15  ;;  %v185_v10 = vadd.f32 %v184_v6, %v477_v15 }
  0x64   :  { %v133_v17 = vmul.f32 0.25, %v132_v16 }
  0x66   :  { %v134_v18 = vsub.f32 %v423_v1, %v133_v17  ;;  %v136_v19 = vsub.f32 %v425_v2, %v133_v17  ;;  %v139_v20 = vsub.f32 %v428_v4, %v133_v17  ;;  %v142_v23 = vsub.f32 %v477_v15, %v133_v17 }
  0x68   :  { %v135_v21 = vmul.f32 %v134_v18, %v134_v18  ;;  %v137_v22 = vmul.f32 %v136_v19, %v136_v19  ;;  %v140_v25 = vmul.f32 %v139_v20, %v139_v20  ;;  %v143_v7 = vmul.f32 %v142_v23, %v142_v23 }
  0x6a   :  { %v138_v24 = vadd.f32 %v137_v22, %v135_v21 }
  0x6c   :  { %v141_v26 = vadd.f32 %v140_v25, %v138_v24 }
  0x6e   :  { %v144_v27 = vadd.f32 %v143_v7, %v141_v26 }
  0x70   :  { %v145_v28 = vmul.f32 0.25, %v144_v27 }
  0x72   :  { %v146_v29 = vadd.f32 1e-05, %v145_v28 }
  0x74   :  { %326 = vrsqrt.f32 %v146_v29  ;;  %vm153_vm8 = vweird.f32 %v146_v29 }
  0x7a   :  { %v327_v30 = vpop.eup %326 }
  0x7b   :  { %v148_v31 = vmul.f32 %v327_v30, %v146_v29  ;;  %vm154_vm7 = vweird.f32 %v327_v30 }
  0x7c   :  { %vm155_vm9 = vmor %vm153_vm8, %vm154_vm7 }
  0x7d   :  { %v149_v32 = vmul.f32 %v327_v30, %v148_v31 }
  0x7f   :  { %v150_v1 = vmul.f32 0.5, %v149_v32 }
  0x81   :  { %v151_v33 = vsub.f32 1.5, %v150_v1 }
  0x83   :  { %v152_v34 = vmul.f32 %v327_v30, %v151_v33 }
  0x85   :  { %v156_v35 = vsel %vm155_vm9, %v327_v30, %v152_v34 }
  0x86   :  { %v158_v36 = vmul.f32 %v156_v35, %v445_v38  ;;  %v157_v60 = vmul.f32 %v156_v35, %v146_v29 }
  0x88   :  { %v159_v37 = vmul.f32 %v158_v36, %v134_v18  ;;  %v161_v39 = vmul.f32 %v158_v36, %v136_v19  ;;  %v163_v40 = vmul.f32 %v158_v36, %v139_v20  ;;  %v165_v41 = vmul.f32 %v158_v36, %v142_v23 }
  0x89   :  { %v180_v5 = vmul.f32 %v157_v60, %v472_v11 }
  0x8a   :  { %v160_v42 = vadd.f32 %v159_v37, %v448_v43  ;;  %v162_v44 = vadd.f32 %v161_v39, %v448_v43  ;;  %v164_v45 = vadd.f32 %v163_v40, %v448_v43  ;;  %v166_v46 = vadd.f32 %v165_v41, %v448_v43 }
  0x8c   :  { %v167_v47 = vsub.f32 %v162_v44, %v160_v42  ;;  %v168_v48 = vsub.f32 %v164_v45, %v162_v44  ;;  %v169_v49 = vsub.f32 %v166_v46, %v164_v45  ;;  %v170_v50 = vmul.f32 %v160_v42, %v453_v51 }
  0x8e   :  { %v171_v53 = vmul.f32 %v167_v47, %v455_v52  ;;  %v173_v55 = vmul.f32 %v168_v48, %v460_v57  ;;  %v175_v58 = vmul.f32 %v169_v49, %v463_v61 }
  0x90   :  { %v172_v54 = vadd.f32 %v171_v53, %v170_v50 }
  0x92   :  { %v174_v56 = vadd.f32 %v173_v55, %v172_v54 }
  0x94   :  { %v176_v59 = vadd.f32 %v175_v58, %v174_v56 }
  0x96   :  { %v177_v62 = vadd.f32 %v176_v59, %v466_v3 }
  0x98   :  { %v178_v63 = vadd.f32 %v177_v62, %v169_v49 }
  0x9a   :  { %v179_v0 = vsub.f32 %v178_v63, %v448_v43  ;;  %v238_v63 = vadd.f32 %v477_v15, %v428_v4 }
  0x9c   :  { %v181_v8 = vmul.f32 %v180_v5, %v179_v0 }
  0x9e   :  { %v182_v9 = vadd.f32 %v181_v8, %v133_v17 }
  0xa0   :  { %183 = vst [vmem:[#allocation7 + $0x1] sm:$0x1] %v182_v9  ;;  %v186_v12 = vadd.f32 %v185_v10, %v182_v9  ;;  %v239_v5 = vadd.f32 %v238_v63, %v182_v9 }
  0xa2   :  { %v187_v13 = vmul.f32 0.25, %v186_v12 }
  0xa4   :  { %v188_v14 = vsub.f32 %v425_v2, %v187_v13  ;;  %v190_v16 = vsub.f32 %v428_v4, %v187_v13  ;;  %v193_v18 = vsub.f32 %v477_v15, %v187_v13  ;;  %v196_v21 = vsub.f32 %v182_v9, %v187_v13 }
  0xa6   :  { %v189_v19 = vmul.f32 %v188_v14, %v188_v14  ;;  %v191_v20 = vmul.f32 %v190_v16, %v190_v16  ;;  %v194_v23 = vmul.f32 %v193_v18, %v193_v18  ;;  %v197_v25 = vmul.f32 %v196_v21, %v196_v21 }
  0xa8   :  { %v192_v22 = vadd.f32 %v191_v20, %v189_v19 }
  0xaa   :  { %v195_v24 = vadd.f32 %v194_v23, %v192_v22 }
  0xac   :  { %v198_v26 = vadd.f32 %v197_v25, %v195_v24 }
  0xae   :  { %v199_v17 = vmul.f32 0.25, %v198_v26 }
  0xb0   :  { %v200_v7 = vadd.f32 1e-05, %v199_v17 }
  0xb2   :  { %328 = vrsqrt.f32 %v200_v7  ;;  %vm207_vm11 = vweird.f32 %v200_v7 }
  0xb8   :  { %v329_v27 = vpop.eup %328 }
  0xb9   :  { %v202_v28 = vmul.f32 %v329_v27, %v200_v7  ;;  %vm208_vm10 = vweird.f32 %v329_v27 }
  0xba   :  { %vm209_vm12 = vmor %vm207_vm11, %vm208_vm10 }
  0xbb   :  { %v203_v29 = vmul.f32 %v329_v27, %v202_v28 }
  0xbd   :  { %v204_v30 = vmul.f32 0.5, %v203_v29 }
  0xbf   :  { %v205_v2 = vsub.f32 1.5, %v204_v30 }
  0xc1   :  { %v206_v31 = vmul.f32 %v329_v27, %v205_v2 }
  0xc3   :  { %v210_v32 = vsel %vm209_vm12, %v329_v27, %v206_v31 }
  0xc4   :  { %v212_v1 = vmul.f32 %v210_v32, %v445_v38  ;;  %v211_v55 = vmul.f32 %v210_v32, %v200_v7 }
  0xc6   :  { %v213_v33 = vmul.f32 %v212_v1, %v188_v14  ;;  %v215_v34 = vmul.f32 %v212_v1, %v190_v16  ;;  %v217_v35 = vmul.f32 %v212_v1, %v193_v18  ;;  %v219_v36 = vmul.f32 %v212_v1, %v196_v21 }
  0xc7   :  { %v234_v60 = vmul.f32 %v211_v55, %v472_v11 }
  0xc8   :  { %v214_v37 = vadd.f32 %v213_v33, %v448_v43  ;;  %v216_v39 = vadd.f32 %v215_v34, %v448_v43  ;;  %v218_v40 = vadd.f32 %v217_v35, %v448_v43  ;;  %v220_v41 = vadd.f32 %v219_v36, %v448_v43 }
  0xca   :  { %v221_v42 = vsub.f32 %v216_v39, %v214_v37  ;;  %v222_v44 = vsub.f32 %v218_v40, %v216_v39  ;;  %v223_v45 = vsub.f32 %v220_v41, %v218_v40  ;;  %v224_v46 = vmul.f32 %v214_v37, %v453_v51 }
  0xcc   :  { %v225_v47 = vmul.f32 %v221_v42, %v455_v52  ;;  %v227_v49 = vmul.f32 %v222_v44, %v460_v57  ;;  %v229_v53 = vmul.f32 %v223_v45, %v463_v61 }
  0xce   :  { %v226_v48 = vadd.f32 %v225_v47, %v224_v46 }
  0xd0   :  { %v228_v50 = vadd.f32 %v227_v49, %v226_v48 }
  0xd2   :  { %v230_v54 = vadd.f32 %v229_v53, %v228_v50 }
  0xd4   :  { %v231_v56 = vadd.f32 %v230_v54, %v466_v3 }
  0xd6   :  { %v232_v58 = vadd.f32 %v231_v56, %v223_v45 }
  0xd8   :  { %v233_v59 = vsub.f32 %v232_v58, %v448_v43 }
  0xda   :  { %v235_v62 = vmul.f32 %v234_v60, %v233_v59 }
  0xdc   :  { %v236_v0 = vadd.f32 %v235_v62, %v187_v13 }
  0xde   :  { %237 = vst [vmem:[#allocation7 + $0x2] sm:$0x1] %v236_v0  ;;  %v240_v6 = vadd.f32 %v239_v5, %v236_v0 }
  0xe0   :  { %v241_v8 = vmul.f32 0.25, %v240_v6 }
  0xe2   :  { %v242_v10 = vsub.f32 %v428_v4, %v241_v8  ;;  %v244_v12 = vsub.f32 %v477_v15, %v241_v8  ;;  %v247_v14 = vsub.f32 %v182_v9, %v241_v8  ;;  %v250_v19 = vsub.f32 %v236_v0, %v241_v8 }
  0xe4   :  { %v243_v16 = vmul.f32 %v242_v10, %v242_v10  ;;  %v245_v18 = vmul.f32 %v244_v12, %v244_v12  ;;  %v248_v21 = vmul.f32 %v247_v14, %v247_v14  ;;  %v251_v23 = vmul.f32 %v250_v19, %v250_v19 }
  0xe6   :  { %v246_v20 = vadd.f32 %v245_v18, %v243_v16 }
  0xe8   :  { %v249_v22 = vadd.f32 %v248_v21, %v246_v20 }
  0xea   :  { %v252_v24 = vadd.f32 %v251_v23, %v249_v22 }
  0xec   :  { %v253_v25 = vmul.f32 0.25, %v252_v24 }
  0xee   :  { %v254_v26 = vadd.f32 1e-05, %v253_v25 }
  0xf0   :  { %330 = vrsqrt.f32 %v254_v26  ;;  %vm261_vm14 = vweird.f32 %v254_v26 }
  0xf6   :  { %v331_v13 = vpop.eup %330 }
  0xf7   :  { %v256_v17 = vmul.f32 %v331_v13, %v254_v26  ;;  %vm262_vm13 = vweird.f32 %v331_v13 }
  0xf8   :  { %vm263_vm15 = vmor %vm261_vm14, %vm262_vm13 }
  0xf9   :  { %v257_v7 = vmul.f32 %v331_v13, %v256_v17 }
  0xfb   :  { %v258_v27 = vmul.f32 0.5, %v257_v7 }
  0xfd   :  { %v259_v28 = vsub.f32 1.5, %v258_v27 }
  0xff   :  { %v260_v4 = vmul.f32 %v331_v13, %v259_v28 }
 0x101   :  { %v264_v15 = vsel %vm263_vm15, %v331_v13, %v260_v4 }
 0x102   :  { %v266_v9 = vmul.f32 %v264_v15, %v445_v38  ;;  %v265_v46 = vmul.f32 %v264_v15, %v254_v26 }
 0x104   :  { %v267_v29 = vmul.f32 %v266_v9, %v242_v10  ;;  %v269_v30 = vmul.f32 %v266_v9, %v244_v12  ;;  %v271_v2 = vmul.f32 %v266_v9, %v247_v14  ;;  %v273_v31 = vmul.f32 %v266_v9, %v250_v19 }
 0x105   :  { %v288_v50 = vmul.f32 %v265_v46, %v472_v11 }
 0x106   :  { %v268_v32 = vadd.f32 %v267_v29, %v448_v43  ;;  %v270_v1 = vadd.f32 %v269_v30, %v448_v43  ;;  %v272_v33 = vadd.f32 %v271_v2, %v448_v43  ;;  %v274_v34 = vadd.f32 %v273_v31, %v448_v43 }
 0x108   :  { %v275_v35 = vsub.f32 %v270_v1, %v268_v32  ;;  %v276_v36 = vsub.f32 %v272_v33, %v270_v1  ;;  %v277_v37 = vsub.f32 %v274_v34, %v272_v33  ;;  %v278_v39 = vmul.f32 %v268_v32, %v453_v51 }
 0x10a   :  { %v279_v40 = vmul.f32 %v275_v35, %v455_v52  ;;  %v281_v41 = vmul.f32 %v276_v36, %v460_v57  ;;  %v283_v44 = vmul.f32 %v277_v37, %v463_v61 }
 0x10c   :  { %v280_v38 = vadd.f32 %v279_v40, %v278_v39 }
 0x10e   :  { %v282_v42 = vadd.f32 %v281_v41, %v280_v38 }
 0x110   :  { %v284_v45 = vadd.f32 %v283_v44, %v282_v42 }
 0x112   :  { %v285_v47 = vadd.f32 %v284_v45, %v466_v3 }
 0x114   :  { %v286_v48 = vadd.f32 %v285_v47, %v277_v37 }
 0x116   :  { %v287_v49 = vsub.f32 %v286_v48, %v448_v43 }
 0x118   :  { %v289_v51 = vmul.f32 %v288_v50, %v287_v49 }
 0x11a   :  { %v290_v52 = vadd.f32 %v289_v51, %v241_v8 }
 0x11c   :  { %291 = vst [vmem:[#allocation7 + $0x3] sm:$0x1] %v290_v52 }
 0x11d   :  { %302 = dma.vmem_to_hbm [thread:$0]  %s298_s26, 128, %s300_s29, [#allocation4]  }
 0x11e   :  { %396 = dma.done.wait [#allocation4], 128  }
 0x11f   :  { %397 = vsyncadd [#allocation4], 4294967168 }
 0x120   :  { %307 = vsyncpa [#allocation3], 1 }
 0x121   :  { %308 = vsyncpa [#allocation4], 1 }
 0x122   :  { %309 = vsyncpa [#allocation5], 1 }

</bundles_post_ra>
